<compile_context>
chip_gen: v7x
topology: tpu7x:2x2x1
jax: 0.10.0
libtpu: 0.0.40
codegen_flags: <defaults>
</compile_context>

<pallas_src>
import math
from functools import partial

import jax
import jax.numpy as jnp
from jax.experimental import pallas as pl
from jax.experimental.pallas import tpu as pltpu

_LANE = 128
_TWO_PI = 2.0 * math.pi
_NUM_CORE_SPLITS = 2          # leading "parallel" grid axis (v7x has 2 TCs)


# --------------------------------------------------------------------------
# Layout helpers (run once per parameter / shape).
# --------------------------------------------------------------------------
def _layout(dim: int, block_rows: int):
    """Return (bm, steps_per_core, rows_pad) for a dim-element vector."""
    rows = -(-dim // _LANE)                                   # ceil(D / 128)
    bm = ((max(8, int(block_rows)) + 7) // 8) * 8             # multiple of 8
    bm = min(bm, ((rows + 7) // 8) * 8)                       # don't exceed need
    steps_per_core = -(-rows // (_NUM_CORE_SPLITS * bm))
    rows_pad = _NUM_CORE_SPLITS * bm * steps_per_core
    return bm, steps_per_core, rows_pad


def _pad_to_layout(x_flat: jax.Array, rows_pad: int) -> jax.Array:
    """Zero-pad a 1-D f32 vector and reshape to (rows_pad, 128)."""
    dim = x_flat.shape[0]
    pad = rows_pad * _LANE - dim
    return jnp.pad(x_flat.astype(jnp.float32), (0, pad)).reshape(rows_pad, _LANE)


def _make_tables(dim: int, rows_pad: int):
    """sin/cos of the torch.linspace(0, 2*pi, dim) angles, padded with zeros."""
    ang = jnp.linspace(0.0, _TWO_PI, dim, dtype=jnp.float32)
    sin2d = _pad_to_layout(jnp.sin(ang), rows_pad)
    cos2d = _pad_to_layout(jnp.cos(ang), rows_pad)
    return sin2d, cos2d


# --------------------------------------------------------------------------
# Pallas loss kernel.
# --------------------------------------------------------------------------
def _loss_from_layout(param2d, sin2d, cos2d, phase, *, dim, bm, steps_per_core):
    """mean((param - sin(linspace + phase))^2) from pre-padded layouts."""
    rows_pad = param2d.shape[0]
    assert rows_pad == _NUM_CORE_SPLITS * bm * steps_per_core

    # cos(phase), sin(phase) computed once on the scalar path.
    phi = jnp.stack([jnp.cos(phase), jnp.sin(phase)]).astype(jnp.float32)

    def kernel(phi_ref, p_ref, s_ref, c_ref, o_ref):
        i = pl.program_id(1)                     # reduction axis (arbitrary)

        @pl.when(i == 0)
        def _init():
            o_ref[...] = jnp.zeros_like(o_ref)

        cp = phi_ref[0]
        sp = phi_ref[1]
        # target = sin(angle + phase) via angle addition; padded tail of
        # param and both tables is zero, so it contributes nothing.
        d = p_ref[...] - (s_ref[...] * cp + c_ref[...] * sp)
        d2 = d * d
        # Pure-VPU partial accumulation into the resident (1, 8, 128) output
        # block (no scratch, no per-step cross-lane reduction).
        o_ref[...] += d2.reshape(bm // 8, 8, _LANE).sum(axis=0).reshape(1, 8, _LANE)

    tile_map = lambda c, i: (c * steps_per_core + i, 0)

    out = pl.pallas_call(
        kernel,
        out_shape=jax.ShapeDtypeStruct((_NUM_CORE_SPLITS, 8, _LANE), jnp.float32),
        grid=(_NUM_CORE_SPLITS, steps_per_core),
        in_specs=[
            pl.BlockSpec(memory_space=pltpu.SMEM),         # [cos(ph), sin(ph)]
            pl.BlockSpec((bm, _LANE), tile_map),           # param tiles
            pl.BlockSpec((bm, _LANE), tile_map),           # sin table tiles
            pl.BlockSpec((bm, _LANE), tile_map),           # cos table tiles
        ],
        out_specs=pl.BlockSpec((1, 8, _LANE), lambda c, i: (c, 0, 0)),
        compiler_params=pltpu.CompilerParams(
            dimension_semantics=("parallel", "arbitrary"),
            vmem_limit_bytes=32 * 1024 * 1024,
        ),
        cost_estimate=pl.CostEstimate(
            flops=7 * rows_pad * _LANE,
            transcendentals=0,
            bytes_accessed=3 * rows_pad * _LANE * 4 + 8 + _NUM_CORE_SPLITS * 8 * _LANE * 4,
        ),
    )(phi, param2d, sin2d, cos2d)

    # Tiny (2, 8, 128) -> scalar reduction + 1/dim scale, fused by XLA.
    return jnp.sum(out) * jnp.float32(1.0 / dim)


@partial(jax.jit, static_argnames=("dim", "bm", "steps_per_core"))
def _loss_jit(param2d, sin2d, cos2d, phase, *, dim, bm, steps_per_core):
    return _loss_from_layout(param2d, sin2d, cos2d, phase,
                             dim=dim, bm=bm, steps_per_core=steps_per_core)


@partial(jax.jit, static_argnames=("dim", "bm", "steps_per_core"))
def _step_jit(param2d, sin2d, cos2d, phase, frequency, *, dim, bm, steps_per_core):
    """Advance phase on-device (stored range-reduced mod 2*pi) + loss."""
    new_phase = jnp.mod(phase + frequency, jnp.float32(_TWO_PI))
    loss = _loss_from_layout(param2d, sin2d, cos2d, new_phase,
                             dim=dim, bm=bm, steps_per_core=steps_per_core)
    return loss, new_phase


# --------------------------------------------------------------------------
# Convenience entry point for arbitrary 1-D params (pads on the fly).
# --------------------------------------------------------------------------
def shifting_sphere_loss(param, phase, *, block_rows: int = 4096):
    dim = param.shape[0]
    bm, steps_per_core, rows_pad = _layout(dim, block_rows)
    param2d = _pad_to_layout(param, rows_pad)
    sin2d, cos2d = _make_tables(dim, rows_pad)
    return _loss_jit(param2d, sin2d, cos2d, jnp.asarray(phase, jnp.float32),
                     dim=dim, bm=bm, steps_per_core=steps_per_core)


# --------------------------------------------------------------------------
# Stateful wrapper mirroring the PyTorch module.
# --------------------------------------------------------------------------
class ShiftingSphere:
    """Padded param + sin/cos tables cached once; phase kept on device."""

    def __init__(self, dim: int, frequency: float, key: jax.Array,
                 *, block_rows: int = 4096):
        self.dim = int(dim)
        self.frequency = jnp.float32(1.0 / frequency * 1.1)
        self.phase = jnp.zeros((), dtype=jnp.float32)
        self._bm, self._steps, rows_pad = _layout(self.dim, block_rows)
        param = jax.random.normal(key, (self.dim,), dtype=jnp.float32)
        self._param2d = _pad_to_layout(param, rows_pad)          # cached layout
        self._sin2d, self._cos2d = _make_tables(self.dim, rows_pad)

    @property
    def param(self) -> jax.Array:
        return self._param2d.reshape(-1)[: self.dim]

    def __call__(self) -> jax.Array:
        loss, self.phase = _step_jit(
            self._param2d, self._sin2d, self._cos2d, self.phase, self.frequency,
            dim=self.dim, bm=self._bm, steps_per_core=self._steps)
        return loss


def _reference(param, phase):
    dim = param.shape[0]
    target = jnp.sin(jnp.linspace(0.0, _TWO_PI, dim, dtype=jnp.float32)
                     + jnp.asarray(phase, jnp.float32))
    return jnp.mean((param - target) ** 2)


if __name__ == "__main__":
    key = jax.random.PRNGKey(0)
    dim = 256
    frequency = 10.0

    model = ShiftingSphere(dim, frequency, key)

    # Run forward a couple of times (phase advances each call, like PyTorch).
    out1 = model()
    out2 = model()
    jax.block_until_ready(out2)

    assert out1.shape == () and out1.dtype == jnp.float32
    ref2 = _reference(model.param, model.phase)
    assert jnp.allclose(out2, ref2, rtol=2e-5, atol=2e-5), (out2, ref2)

    # Exercise multi-step accumulation per core + padded trailing blocks.
    p2 = jax.random.normal(jax.random.PRNGKey(1), (5000,), dtype=jnp.float32)
    ph2 = jnp.float32(0.37)
    got = shifting_sphere_loss(p2, ph2, block_rows=8)   # grid = (2, 3)
    jax.block_until_ready(got)
    refg = _reference(p2, ph2)
    assert jnp.allclose(got, refg, rtol=2e-5, atol=2e-5), (got, refg)

    # Exercise the padding/mask-free path with a 2000-element vector too.
    p3 = jax.random.normal(jax.random.PRNGKey(2), (2000,), dtype=jnp.float32)
    got3 = shifting_sphere_loss(p3, jnp.float32(1.23), block_rows=8)
    jax.block_until_ready(got3)
    ref3 = _reference(p3, jnp.float32(1.23))
    assert jnp.allclose(got3, ref3, rtol=2e-5, atol=2e-5), (got3, ref3)

    print("KERNEL_OK")
</pallas_src>

<mosaic_0001>
module attributes {stable_mosaic.version = 11 : i64} {
  func.func @kernel(%arg0: i32, %arg1: i32, %arg2: memref<2xf32, #tpu.memory_space<smem>>, %arg3: memref<8x128xf32, #tpu.memory_space<vmem>>, %arg4: memref<8x128xf32, #tpu.memory_space<vmem>>, %arg5: memref<8x128xf32, #tpu.memory_space<vmem>>, %arg6: memref<1x8x128xf32, #tpu.memory_space<vmem>>) attributes {dimension_semantics = [#tpu.dimension_semantics<parallel>, #tpu.dimension_semantics<arbitrary>], iteration_bounds = array<i64: 2, 1>, scalar_prefetch = 0 : i64, scratch_operands = 0 : i64, tpu.core_type = #tpu.core_type<tc>, window_params = [{transform_indices = @transform_0, window_bounds = array<i64: 2>}, {transform_indices = @transform_1, window_bounds = array<i64: 8, 128>}, {transform_indices = @transform_2, window_bounds = array<i64: 8, 128>}, {transform_indices = @transform_3, window_bounds = array<i64: 8, 128>}, {transform_indices = @transform_4, window_bounds = array<i64: 1, 8, 128>}]} {
    %c0_i32 = arith.constant 0 : i32
    %0 = arith.cmpi eq, %arg1, %c0_i32 : i32
    %1 = arith.extui %0 : i1 to i32
    %c0_i32_0 = arith.constant 0 : i32
    %2 = arith.cmpi ne, %1, %c0_i32_0 : i32
    scf.if %2 {
      %cst_13 = arith.constant 0.000000e+00 : f32
      %21 = vector.broadcast %cst_13 : f32 to vector<1x8x128xf32>
      %c0_14 = arith.constant 0 : index
      %c0_15 = arith.constant 0 : index
      %c0_16 = arith.constant 0 : index
      %22 = vector.load %arg6[%c0_14, %c0_15, %c0_16] : memref<1x8x128xf32, #tpu.memory_space<vmem>>, vector<1x8x128xf32>
      tpu.vector_store %arg6[%c0_14, %c0_15, %c0_16], %21 {strides = array<i32>} : memref<1x8x128xf32, #tpu.memory_space<vmem>>, vector<1x8x128xf32>,
    } else {
    }
    %c0 = arith.constant 0 : index
    %3 = memref.load %arg2[%c0] : memref<2xf32, #tpu.memory_space<smem>>
    %c1 = arith.constant 1 : index
    %4 = memref.load %arg2[%c1] : memref<2xf32, #tpu.memory_space<smem>>
    %c0_1 = arith.constant 0 : index
    %c0_2 = arith.constant 0 : index
    %5 = vector.load %arg3[%c0_1, %c0_2] : memref<8x128xf32, #tpu.memory_space<vmem>>, vector<8x128xf32>
    %c0_3 = arith.constant 0 : index
    %c0_4 = arith.constant 0 : index
    %6 = vector.load %arg4[%c0_3, %c0_4] : memref<8x128xf32, #tpu.memory_space<vmem>>, vector<8x128xf32>
    %7 = vector.broadcast %3 : f32 to vector<8x128xf32>
    %8 = arith.mulf %6, %7 : vector<8x128xf32>
    %c0_5 = arith.constant 0 : index
    %c0_6 = arith.constant 0 : index
    %9 = vector.load %arg5[%c0_5, %c0_6] : memref<8x128xf32, #tpu.memory_space<vmem>>, vector<8x128xf32>
    %10 = vector.broadcast %4 : f32 to vector<8x128xf32>
    %11 = arith.mulf %9, %10 : vector<8x128xf32>
    %12 = arith.addf %8, %11 : vector<8x128xf32>
    %13 = arith.subf %5, %12 : vector<8x128xf32>
    %14 = arith.mulf %13, %13 : vector<8x128xf32>
    %c0_7 = arith.constant 0 : index
    %c0_8 = arith.constant 0 : index
    %c0_9 = arith.constant 0 : index
    %15 = vector.load %arg6[%c0_7, %c0_8, %c0_9] : memref<1x8x128xf32, #tpu.memory_space<vmem>>, vector<1x8x128xf32>
    %16 = vector.shape_cast %14 : vector<8x128xf32> to vector<1x8x128xf32>
    %cst = arith.constant dense<0.000000e+00> : vector<8x128xf32>
    %17 = vector.multi_reduction <add>, %16, %cst [0] : vector<1x8x128xf32> to vector<8x128xf32>
    %18 = vector.shape_cast %17 : vector<8x128xf32> to vector<1x8x128xf32>
    %19 = arith.addf %15, %18 : vector<1x8x128xf32>
    %c0_10 = arith.constant 0 : index
    %c0_11 = arith.constant 0 : index
    %c0_12 = arith.constant 0 : index
    %20 = vector.load %arg6[%c0_10, %c0_11, %c0_12] : memref<1x8x128xf32, #tpu.memory_space<vmem>>, vector<1x8x128xf32>
    tpu.vector_store %arg6[%c0_10, %c0_11, %c0_12], %19 {strides = array<i32>} : memref<1x8x128xf32, #tpu.memory_space<vmem>>, vector<1x8x128xf32>,
    return
  }
  func.func @transform_0(%arg0: i32, %arg1: i32) -> i32 {
    %c0_i32 = arith.constant 0 : i32
    %c0_i32_0 = arith.constant 0 : i32
    return %c0_i32 : i32
  }
  func.func @transform_1(%arg0: i32, %arg1: i32) -> (i32, i32) {
    %c1_i32 = arith.constant 1 : i32
    %0 = arith.muli %arg0, %c1_i32 : i32
    %1 = arith.addi %0, %arg1 : i32
    %c0_i32 = arith.constant 0 : i32
    %c0_i32_0 = arith.constant 0 : i32
    return %1, %c0_i32 : i32, i32
  }
  func.func @transform_2(%arg0: i32, %arg1: i32) -> (i32, i32) {
    %c1_i32 = arith.constant 1 : i32
    %0 = arith.muli %arg0, %c1_i32 : i32
    %1 = arith.addi %0, %arg1 : i32
    %c0_i32 = arith.constant 0 : i32
    %c0_i32_0 = arith.constant 0 : i32
    return %1, %c0_i32 : i32, i32
  }
  func.func @transform_3(%arg0: i32, %arg1: i32) -> (i32, i32) {
    %c1_i32 = arith.constant 1 : i32
    %0 = arith.muli %arg0, %c1_i32 : i32
    %1 = arith.addi %0, %arg1 : i32
    %c0_i32 = arith.constant 0 : i32
    %c0_i32_0 = arith.constant 0 : i32
    return %1, %c0_i32 : i32, i32
  }
  func.func @transform_4(%arg0: i32, %arg1: i32) -> (i32, i32, i32) {
    %c0_i32 = arith.constant 0 : i32
    %c0_i32_0 = arith.constant 0 : i32
    %c0_i32_1 = arith.constant 0 : i32
    return %arg0, %c0_i32, %c0_i32_0 : i32, i32, i32
  }
}

</mosaic_0001>

<bundles_post_ra>
// kernel: _step_jit.1
= control target key start
LH: loop header
LB: loop body
LE: loop exit
PB: predicated region body
PF: predicated region fallthrough
CT: control target
= control target key end

     0   :  { %9 = vsyncpa [#allocation3], 0  ;;  %s512_s15 = smov 0   ;;  %s514_s16 = smov 0   ;;  %s577_s0 = inlined_call_operand.vmem [shape: f32[2], index: 0, kind: input, shape index: {}]   ;;  %s578_s1 = inlined_call_operand.vmem [shape: f32[16,128], index: 1, kind: input, shape index: {}]   ;;  %s579_s2 = inlined_call_operand.vmem [shape: f32[16,128], index: 2, kind: input, shape index: {}]   ;;  %s580_s3 = inlined_call_operand.vmem [shape: f32[16,128], index: 3, kind: input, shape index: {}]   ;;  %s581_s4 = inlined_call_operand.vmem [shape: f32[2,8,128], index: 4, kind: output, shape index: {}]  }
   0x1   :  { %s516_s17 = smov 0  }
   0x2 LB: > { %s393_s18 = sadd.s32 4294967295, %s484_s17   ;;  %s27_s19 = sadd.s32 1, %s480_s16  ;;  %s484_s17 = sphi %s516_s17, %s15_s17   ;;  %s480_s16 = sphi %s514_s16, %s585_s16   ;;  %s476_s15 = sphi %s512_s15, %s584_s15  }
   0x3   : > { %p29_p0 = scmp.ge.s32.totalorder %s27_s19, 2  ;;  %p395_p1 = scmp.ge.s32.totalorder %s484_s17, 1 }
   0x4   : > { %p163_p2 = scmp.lt.s32.totalorder %s484_s17, 3  ;;  %p537_p4 = scmp.eq.s32.totalorder %s393_s18, 0 }
   0x5   : > { %s587_s19 = smov (%p29_p0, %s27_s19), 0  ;;  %s176_s24 = sshll.u32 %s577_s0, 4  ;;  %s177_s24 = int_to_ptr.vmem [resolvable:$true] %s176_s24 }
   0x6   : > { %p533_p3 = pnand %p395_p1, %p163_p2  ;;  %s443_s25 = scalar_lea.vmem %s177_s24, 16 }
   0x7   : > { %p444_p7 = scmp.ne.s32.totalorder %s177_s24, %s443_s25  ;;  %p451_p11 = scmp.lt.s32.totalorder %s177_s24, %s177_s24 }
   0x8   : > { %p411_p5 = pneg %p533_p3  ;;  %p452_p12 = scmp.lt.s32.totalorder %s443_s25, %s443_s25 }
   0xa   : > { %p412_p6 = pnand %p537_p4, %p411_p5  ;;  %p453_p13 = por %p452_p12, %p451_p11 }
   0xc   : > { %p445_p8 = pneg %p412_p6 }
   0xe   : > { %p446_p9 = pnand %p445_p8, %p444_p7 }
  0x10   : > { %p447_p10 = pneg %p446_p9 }
  0x12   : > { %p454_p0 = pnand %p453_p13, %p447_p10 }
  0x14   : > { %457 = shalt.err (!%p454_p0)
}
  0x15   : > { %s486_s26 = smov [#allocation2]   ;;  %216 = sbr.rel (%p533_p3) target bundleno = 48 (0x30), region = 36 }
  0x16   : > { %414 = dma.vmem_to_smem (!%p412_p6), %s177_s24, 16, %s486_s26, [#allocation3]  }
  0x1c   : > { %471 = dma.done.wait (%p537_p4), [#allocation3], 16  }
  0x1d   : > { %473 = vsyncadd (%p537_p4), [#allocation3], 4294967280 }
  0x1e   : > { %222 = sfence }
  0x1f   : > { %p253_p1 = scmp.lt.s32.totalorder %s476_s15, 1  ;;  %s279_s27 = sld [smem:[#allocation2]] }
  0x20   : > { %s404_s28 = sld [smem:[#allocation2 + $0x1]] }
  0x21   : > { %s589_s15 = smov (!%p253_p1, %s476_s15), 1 }
  0x22   : > { %s400_s29 = sshll.u32 %s589_s15, 3 }
  0x23   : > { %s262_s6 = scalar_lea.vmem %s579_s2, %s400_s29  ;;  %s268_s9 = scalar_lea.vmem %s580_s3, %s400_s29 }
  0x24   : > { %v282_v0 = vld [vmem:[%s262_s6] sm:$0xff]  ;;  %s256_s12 = scalar_lea.vmem %s578_s1, %s400_s29  ;;  %s273_s15 = scalar_lea.vmem %s581_s4, %s400_s29 }
  0x25   : > { %v285_v1 = vld [vmem:[%s268_s9] sm:$0xff]  ;;  %v283_v2 = vstv %s279_s27 }
  0x26   : > { %v284_v3 = vmul.f32 %v283_v2, %v282_v0  ;;  %v286_v4 = vstv %s404_s28  ;;  %v281_v6 = vld [vmem:[%s256_s12] sm:$0xff] }
  0x27   : > { %v287_v5 = vmul.f32 %v286_v4, %v285_v1 }
  0x29   : > { %v288_v7 = vadd.f32 %v287_v5, %v284_v3 }
  0x2b   : > { %v289_v8 = vsub.f32 %v281_v6, %v288_v7 }
  0x2d   : > { %v290_v9 = vmul.f32 %v289_v8, %v289_v8 }
  0x2f   : > { %294 = vst [vmem:[%s273_s15] sm:$0xff] %v290_v9 }
  0x30 PF: > { %s15_s17 = sadd.s32 1, %s484_s17   ;;  %s584_s15 = smov %s480_s16 }
  0x31   : > { %p12_p2 = scmp.ge.s32.totalorder %s15_s17, 4   ;;  %s585_s16 = smov %s587_s19 }
  0x33   :  { %14 = sbr.rel (!%p12_p2) target bundleno = 2 (0x2), region = 81 }
  0x3a   :  { %314 = vsyncpa [#allocation3], 1 }
  0x3b   :  { %316 = vsyncpa [#allocation3 + $0x1], 1 }

</bundles_post_ra>
